<compile_context>
chip_gen: v5e
topology: v5e:2x2
jax: 0.10.0
libtpu: 0.0.40
codegen_flags: <defaults>
</compile_context>

<pallas_src>
import functools
import math

import jax
import jax.numpy as jnp
from jax.experimental import pallas as pl
from jax.experimental.pallas import tpu as pltpu

COMPUTE_DTYPE = jnp.bfloat16          # MXU operand dtype (accumulation is f32)
MASK_VALUE = -1e30                    # finite mask value -> no NaN from masked tiles
VMEM_LIMIT = 32 * 1024 * 1024         # explicit scoped-VMEM limit, safe on v5e/v6e/v7x


# ----------------------------- tiling helpers --------------------------------

def _pick_tile(dim, preferred, align):
    """Largest tile <= preferred that divides `dim` and is a multiple of `align`;
    falls back to the full dimension (always a legal block shape)."""
    if dim <= preferred:
        return dim
    t = (preferred // align) * align
    while t >= align:
        if dim % t == 0:
            return t
        t -= align
    return dim


def _pick_group(dim, preferred):
    """Largest divisor of `dim` that is <= preferred (for un-tiled leading axes)."""
    if dim <= preferred:
        return dim
    for t in range(preferred, 0, -1):
        if dim % t == 0:
            return t
    return 1


# ----------------------------- Pallas kernels --------------------------------

def _matmul_bias_kernel(x_ref, w_ref, b_ref, o_ref, acc_ref):
    # o = x @ w + b, tiled over (M, N, K) with K as the trailing reduction axis.
    @pl.when(pl.program_id(2) == 0)
    def _():
        acc_ref[...] = jnp.zeros_like(acc_ref)

    acc_ref[...] += jnp.dot(x_ref[...].astype(COMPUTE_DTYPE), w_ref[...],
                            preferred_element_type=jnp.float32)

    @pl.when(pl.program_id(2) == pl.num_programs(2) - 1)
    def _():
        o_ref[...] = (acc_ref[...] + b_ref[...]).astype(o_ref.dtype)


def _make_head_proj_kernel(n_proj):
    """n_proj projections of the same activation tile, written per head in
    (B*H, S, Dh) layout: o[h] = x @ W[h] + b[h]."""
    def kernel(*refs):
        x_ref = refs[0]
        w_refs = refs[1:1 + n_proj]
        b_refs = refs[1 + n_proj:1 + 2 * n_proj]
        o_refs = refs[1 + 2 * n_proj:1 + 3 * n_proj]
        x = x_ref[...].astype(COMPUTE_DTYPE)
        for w_ref, b_ref, o_ref in zip(w_refs, b_refs, o_refs):
            y = jnp.dot(x, w_ref[0], preferred_element_type=jnp.float32) + b_ref[0]
            o_ref[...] = y[None].astype(o_ref.dtype)
    return kernel


def _head_merge_out_ln_kernel(oh_ref, wo_ref, bo_ref, r_ref, g_ref, beta_ref,
                              o_ref, acc_ref):
    # o = LayerNorm(residual + concat_heads(oh) @ Wo + bo); the head axis is the
    # streamed reduction axis, so the merged activation never hits HBM.
    @pl.when(pl.program_id(2) == 0)
    def _():
        acc_ref[...] = jnp.zeros_like(acc_ref)

    acc_ref[...] += jnp.dot(oh_ref[0].astype(COMPUTE_DTYPE), wo_ref[0],
                            preferred_element_type=jnp.float32)

    @pl.when(pl.program_id(2) == pl.num_programs(2) - 1)
    def _():
        y = acc_ref[...] + bo_ref[...] + r_ref[...]
        mean = jnp.mean(y, axis=-1, keepdims=True)
        d = y - mean
        var = jnp.mean(d * d, axis=-1, keepdims=True)
        o_ref[...] = (d * jax.lax.rsqrt(var + 1e-5) * g_ref[...]
                      + beta_ref[...]).astype(o_ref.dtype)


def _ffn_add_ln_kernel(x_ref, w1_ref, b1_ref, w2_ref, b2_ref, r_ref, g_ref,
                       beta_ref, o_ref, acc_ref):
    # Whole FeedForward + residual + LayerNorm in one kernel; the 2048-wide hidden
    # activation is streamed through VMEM block-by-block and never hits HBM.
    @pl.when(pl.program_id(1) == 0)
    def _():
        acc_ref[...] = jnp.zeros_like(acc_ref)

    h = jnp.dot(x_ref[...].astype(COMPUTE_DTYPE), w1_ref[...],
                preferred_element_type=jnp.float32) + b1_ref[...]
    h = jnp.maximum(h, 0.0).astype(COMPUTE_DTYPE)
    acc_ref[...] += jnp.dot(h, w2_ref[...], preferred_element_type=jnp.float32)

    @pl.when(pl.program_id(1) == pl.num_programs(1) - 1)
    def _():
        y = acc_ref[...] + b2_ref[...] + r_ref[...]
        mean = jnp.mean(y, axis=-1, keepdims=True)
        d = y - mean
        var = jnp.mean(d * d, axis=-1, keepdims=True)
        o_ref[...] = (d * jax.lax.rsqrt(var + 1e-5) * g_ref[...]
                      + beta_ref[...]).astype(o_ref.dtype)


def _flash_attn_kernel(q_ref, k_ref, v_ref, o_ref, m_scr, l_scr, acc_scr, *, causal):
    # Flash-style attention: online softmax over KV blocks, several heads per step.
    # The 1/sqrt(Dh) scale is already folded into the Q projection weights.
    qi = pl.program_id(1)
    ki = pl.program_id(2)
    tq = q_ref.shape[1]
    tk = k_ref.shape[1]

    @pl.when(ki == 0)
    def _():
        m_scr[...] = jnp.full_like(m_scr, -jnp.inf)
        l_scr[...] = jnp.zeros_like(l_scr)
        acc_scr[...] = jnp.zeros_like(acc_scr)

    def compute():
        q = q_ref[...].astype(COMPUTE_DTYPE)
        k = k_ref[...].astype(COMPUTE_DTYPE)
        s = jnp.einsum("hqd,hkd->hqk", q, k, preferred_element_type=jnp.float32)
        if causal:
            row = qi * tq + jax.lax.broadcasted_iota(jnp.int32, (tq, tk), 0)
            col = ki * tk + jax.lax.broadcasted_iota(jnp.int32, (tq, tk), 1)
            s = jnp.where((col <= row)[None, :, :], s, MASK_VALUE)
        m_prev = m_scr[...]
        m_new = jnp.maximum(m_prev, jnp.max(s, axis=-1, keepdims=True))
        alpha = jnp.exp(m_prev - m_new)
        p = jnp.exp(s - m_new)
        l_scr[...] = alpha * l_scr[...] + jnp.sum(p, axis=-1, keepdims=True)
        acc_scr[...] = alpha * acc_scr[...] + jnp.einsum(
            "hqk,hkd->hqd", p.astype(COMPUTE_DTYPE),
            v_ref[...].astype(COMPUTE_DTYPE), preferred_element_type=jnp.float32)
        m_scr[...] = m_new

    if causal:
        # Skip KV blocks that lie entirely above the diagonal (~2x decoder self-attn).
        pl.when(ki * tk <= qi * tq + (tq - 1))(compute)
    else:
        compute()

    @pl.when(ki == pl.num_programs(2) - 1)
    def _():
        inv_l = pl.reciprocal(l_scr[...], approx=True)
        o_ref[...] = (acc_scr[...] * inv_l).astype(o_ref.dtype)


# ----------------------------- Pallas wrappers -------------------------------

def pallas_linear(x, w, b):
    """x:(M,K) f32 @ w:(K,N) bf16 + b:(1,N) f32 -> (M,N) f32, tiled & pipelined."""
    M, K = x.shape
    N = w.shape[1]
    tm = _pick_tile(M, 256, 8)
    tk = _pick_tile(K, 512, 128)
    tn = _pick_tile(N, 512, 128)
    grid = (M // tm, N // tn, K // tk)
    return pl.pallas_call(
        _matmul_bias_kernel,
        grid=grid,
        in_specs=[
            pl.BlockSpec((tm, tk), lambda i, j, k: (i, k)),
            pl.BlockSpec((tk, tn), lambda i, j, k: (k, j)),
            pl.BlockSpec((1, tn), lambda i, j, k: (0, j)),
        ],
        out_specs=pl.BlockSpec((tm, tn), lambda i, j, k: (i, j)),
        out_shape=jax.ShapeDtypeStruct((M, N), jnp.float32),
        scratch_shapes=[pltpu.VMEM((tm, tn), jnp.float32)],
        compiler_params=pltpu.CompilerParams(
            dimension_semantics=("parallel", "parallel", "arbitrary"),
            vmem_limit_bytes=VMEM_LIMIT),
    )(x, w, b)


def pallas_head_proj(x2d, ws, bs, B, S, n_head, Dh):
    """Project x2d:(B*S, D) with len(ws) per-head weight stacks (H, D, Dh) /
    biases (H, 1, Dh) directly into (B*H, S, Dh) bf16 — no XLA head-split
    transpose.  The head axis is innermost so the x tile is fetched once and
    reused across heads."""
    n_proj = len(ws)
    D = x2d.shape[1]
    ts = _pick_tile(S, 256, 8)
    sb = S // ts
    grid = (B, sb, n_head)
    x_spec = pl.BlockSpec((ts, D), lambda b, si, h: (b * sb + si, 0))
    w_spec = pl.BlockSpec((1, D, Dh), lambda b, si, h: (h, 0, 0))
    b_spec = pl.BlockSpec((1, 1, Dh), lambda b, si, h: (h, 0, 0))
    o_spec = pl.BlockSpec((1, ts, Dh), lambda b, si, h: (b * n_head + h, si, 0))
    return pl.pallas_call(
        _make_head_proj_kernel(n_proj),
        grid=grid,
        in_specs=[x_spec] + [w_spec] * n_proj + [b_spec] * n_proj,
        out_specs=[o_spec] * n_proj,
        out_shape=[jax.ShapeDtypeStruct((B * n_head, S, Dh), COMPUTE_DTYPE)
                   for _ in range(n_proj)],
        compiler_params=pltpu.CompilerParams(
            dimension_semantics=("parallel", "parallel", "arbitrary"),
            vmem_limit_bytes=VMEM_LIMIT),
    )(x2d, *ws, *bs)


def pallas_head_merge_out_ln(oh, w_o, b_o, residual, gamma, beta, B, Sq, n_head):
    """LayerNorm(residual + concat_heads(oh) @ Wo + bo).
    oh:(B*H, Sq, Dh) bf16, w_o:(H, Dh, D) bf16 — heads streamed as the reduction
    axis, so the merged per-head output never round-trips through HBM."""
    Dh = oh.shape[-1]
    D = w_o.shape[-1]
    tq = _pick_tile(Sq, 256, 8)
    sb = Sq // tq
    grid = (B, sb, n_head)
    return pl.pallas_call(
        _head_merge_out_ln_kernel,
        grid=grid,
        in_specs=[
            pl.BlockSpec((1, tq, Dh), lambda b, si, h: (b * n_head + h, si, 0)),
            pl.BlockSpec((1, Dh, D), lambda b, si, h: (h, 0, 0)),
            pl.BlockSpec((1, D), lambda b, si, h: (0, 0)),
            pl.BlockSpec((tq, D), lambda b, si, h: (b * sb + si, 0)),
            pl.BlockSpec((1, D), lambda b, si, h: (0, 0)),
            pl.BlockSpec((1, D), lambda b, si, h: (0, 0)),
        ],
        out_specs=pl.BlockSpec((tq, D), lambda b, si, h: (b * sb + si, 0)),
        out_shape=jax.ShapeDtypeStruct((B * Sq, D), jnp.float32),
        scratch_shapes=[pltpu.VMEM((tq, D), jnp.float32)],
        compiler_params=pltpu.CompilerParams(
            dimension_semantics=("parallel", "parallel", "arbitrary"),
            vmem_limit_bytes=VMEM_LIMIT),
    )(oh, w_o, b_o, residual, gamma, beta)


def pallas_ffn_add_ln(x, w1, b1, w2, b2, residual, gamma, beta):
    """LayerNorm(residual + FeedForward(x)) in one kernel, hidden dim streamed."""
    M, D = x.shape
    H = w1.shape[1]
    tm = _pick_tile(M, 256, 8)
    th = _pick_tile(H, 512, 128)
    grid = (M // tm, H // th)
    return pl.pallas_call(
        _ffn_add_ln_kernel,
        grid=grid,
        in_specs=[
            pl.BlockSpec((tm, D), lambda i, h: (i, 0)),
            pl.BlockSpec((D, th), lambda i, h: (0, h)),
            pl.BlockSpec((1, th), lambda i, h: (0, h)),
            pl.BlockSpec((th, D), lambda i, h: (h, 0)),
            pl.BlockSpec((1, D), lambda i, h: (0, 0)),
            pl.BlockSpec((tm, D), lambda i, h: (i, 0)),
            pl.BlockSpec((1, D), lambda i, h: (0, 0)),
            pl.BlockSpec((1, D), lambda i, h: (0, 0)),
        ],
        out_specs=pl.BlockSpec((tm, D), lambda i, h: (i, 0)),
        out_shape=jax.ShapeDtypeStruct((M, D), jnp.float32),
        scratch_shapes=[pltpu.VMEM((tm, D), jnp.float32)],
        compiler_params=pltpu.CompilerParams(
            dimension_semantics=("parallel", "arbitrary"),
            vmem_limit_bytes=VMEM_LIMIT),
    )(x, w1, b1, w2, b2, residual, gamma, beta)


def pallas_flash_attention(q, k, v, *, causal):
    """q/k/v: (B*H, S, Dh) bf16. Flash-style online-softmax attention -> bf16."""
    BH, Sq, Dh = q.shape
    Sk = k.shape[1]
    hb = _pick_group(BH, 16)          # several heads per grid step
    tq = _pick_tile(Sq, 256, 8)
    tk = _pick_tile(Sk, 256, 8)
    grid = (BH // hb, Sq // tq, Sk // tk)
    kernel = functools.partial(_flash_attn_kernel, causal=causal)
    return pl.pallas_call(
        kernel,
        grid=grid,
        in_specs=[
            pl.BlockSpec((hb, tq, Dh), lambda g, qi, ki: (g, qi, 0)),
            pl.BlockSpec((hb, tk, Dh), lambda g, qi, ki: (g, ki, 0)),
            pl.BlockSpec((hb, tk, Dh), lambda g, qi, ki: (g, ki, 0)),
        ],
        out_specs=pl.BlockSpec((hb, tq, Dh), lambda g, qi, ki: (g, qi, 0)),
        out_shape=jax.ShapeDtypeStruct((BH, Sq, Dh), COMPUTE_DTYPE),
        scratch_shapes=[
            pltpu.VMEM((hb, tq, 1), jnp.float32),
            pltpu.VMEM((hb, tq, 1), jnp.float32),
            pltpu.VMEM((hb, tq, Dh), jnp.float32),
        ],
        compiler_params=pltpu.CompilerParams(
            dimension_semantics=("parallel", "parallel", "arbitrary"),
            vmem_limit_bytes=VMEM_LIMIT),
    )(q, k, v)


# ----------------------------- model glue ------------------------------------

def self_attention_heads(x, p, n_head, *, causal):
    """Fused per-head Q/K/V projection (one x read) + flash attention.
    Returns the per-head output (B*H, S, Dh) bf16 (merge/out-proj fused later)."""
    B, S, D = x.shape
    Dh = D // n_head
    x2d = x.reshape(B * S, D)
    q, k, v = pallas_head_proj(x2d, [p["w_q"], p["w_k"], p["w_v"]],
                               [p["b_q"], p["b_k"], p["b_v"]], B, S, n_head, Dh)
    return pallas_flash_attention(q, k, v, causal=causal)


def cross_attention_heads(x_q, x_kv, p, n_head):
    B, Sq, D = x_q.shape
    Sk = x_kv.shape[1]
    Dh = D // n_head
    (q,) = pallas_head_proj(x_q.reshape(B * Sq, D), [p["w_q"]], [p["b_q"]],
                            B, Sq, n_head, Dh)
    k, v = pallas_head_proj(x_kv.reshape(B * Sk, D), [p["w_k"], p["w_v"]],
                            [p["b_k"], p["b_v"]], B, Sk, n_head, Dh)
    return pallas_flash_attention(q, k, v, causal=False)


def encoder_block(x, p, n_head):
    B, S, D = x.shape
    x2d = x.reshape(B * S, D)
    pa = p["mul_attn"]
    oh = self_attention_heads(x, pa, n_head, causal=False)
    x1 = pallas_head_merge_out_ln(oh, pa["w_o"], pa["b_o"], x2d,
                                  p["norm1_w"], p["norm1_b"], B, S, n_head)
    x2 = pallas_ffn_add_ln(x1, p["ff_w1"], p["ff_b1"], p["ff_w2"], p["ff_b2"],
                           x1, p["norm2_w"], p["norm2_b"])
    return x2.reshape(B, S, D)


def decoder_block(x, enc, p, n_head):
    B, S, D = x.shape
    x2d = x.reshape(B * S, D)
    pm = p["masked_attn"]
    oh = self_attention_heads(x, pm, n_head, causal=True)
    x1 = pallas_head_merge_out_ln(oh, pm["w_o"], pm["b_o"], x2d,
                                  p["norm1_w"], p["norm1_b"], B, S, n_head)
    pc = p["cross_mul_attn"]
    oh2 = cross_attention_heads(x1.reshape(B, S, D), enc, pc, n_head)
    x2 = pallas_head_merge_out_ln(oh2, pc["w_o"], pc["b_o"], x1,
                                  p["norm2_w"], p["norm2_b"], B, S, n_head)
    x3 = pallas_ffn_add_ln(x2, p["ff_w1"], p["ff_b1"], p["ff_w2"], p["ff_b2"],
                           x2, p["norm3_w"], p["norm3_b"])
    return x3.reshape(B, S, D)


def transformer_forward(kparams, x_encode, x_decode, n_head):
    enc = x_encode
    for p in kparams["encoders"]:
        enc = encoder_block(enc, p, n_head)
    dec = x_decode
    for p in kparams["decoders"]:
        dec = decoder_block(dec, enc, p, n_head)
    B, Sd, D = dec.shape
    out = pallas_linear(dec.reshape(B * Sd, D), kparams["out_w"], kparams["out_b"])
    return out.reshape(B, Sd, -1)


# ----------------------------- parameter init & prep -------------------------

def _init_linear(key, fan_in, fan_out):
    k1, k2 = jax.random.split(key)
    bound = 1.0 / math.sqrt(fan_in)
    w = jax.random.uniform(k1, (fan_out, fan_in), jnp.float32, -bound, bound)
    b = jax.random.uniform(k2, (fan_out,), jnp.float32, -bound, bound)
    return w, b


def _init_mha(key, d_model):
    k1, k2 = jax.random.split(key)
    lim = math.sqrt(6.0 / (2 * d_model))          # xavier_uniform like in_proj_weight
    return {
        "in_proj_weight": jax.random.uniform(k1, (3 * d_model, d_model), jnp.float32,
                                             -lim, lim),
        "in_proj_bias": jnp.zeros((3 * d_model,), jnp.float32),
        "out_proj_weight": jax.random.uniform(k2, (d_model, d_model), jnp.float32,
                                              -lim, lim),
        "out_proj_bias": jnp.zeros((d_model,), jnp.float32),
    }


def _init_block(key, d_model, is_decoder):
    keys = jax.random.split(key, 4)
    w1, b1 = _init_linear(keys[0], d_model, 2048)
    w2, b2 = _init_linear(keys[1], 2048, d_model)
    p = {
        "ff_w1": w1, "ff_b1": b1, "ff_w2": w2, "ff_b2": b2,     # PyTorch layout (out,in)
        "norm1_w": jnp.ones((d_model,), jnp.float32),
        "norm1_b": jnp.zeros((d_model,), jnp.float32),
        "norm2_w": jnp.ones((d_model,), jnp.float32),
        "norm2_b": jnp.zeros((d_model,), jnp.float32),
    }
    if is_decoder:
        p["masked_attn"] = _init_mha(keys[2], d_model)
        p["cross_mul_attn"] = _init_mha(keys[3], d_model)
        p["norm3_w"] = jnp.ones((d_model,), jnp.float32)
        p["norm3_b"] = jnp.zeros((d_model,), jnp.float32)
    else:
        p["mul_attn"] = _init_mha(keys[2], d_model)
    return p


def init_transformer(key, d_model, num_encoder, num_decoder, vocab_size):
    keys = jax.random.split(key, num_encoder + num_decoder + 1)
    encs = [_init_block(keys[i], d_model, False) for i in range(num_encoder)]
    decs = [_init_block(keys[num_encoder + i], d_model, True)
            for i in range(num_decoder)]
    ow, ob = _init_linear(keys[-1], d_model, vocab_size)
    return {"encoders": encs, "decoders": decs, "out_w": ow, "out_b": ob}


def _prep_mha(p, n_head):
    """Kernel-format MHA params: per-head (H, D, Dh) bf16 projection weight stacks,
    per-head (H, 1, Dh) f32 biases, 1/sqrt(Dh) folded into Q, and the out-proj as
    a (H, Dh, D) bf16 stack for head-streamed accumulation (all done once, free)."""
    D = p["in_proj_weight"].shape[1]
    Dh = D // n_head
    scale = 1.0 / math.sqrt(Dh)
    w_in, b_in = p["in_proj_weight"], p["in_proj_bias"]

    def per_head_w(w_rows):    # PyTorch (out,in) -> kernel (H, D_in, Dh)
        return (w_rows.T.reshape(D, n_head, Dh).transpose(1, 0, 2)
                .astype(COMPUTE_DTYPE))

    def per_head_b(b_rows):
        return b_rows.reshape(n_head, 1, Dh).astype(jnp.float32)

    return {
        "w_q": per_head_w(w_in[:D] * scale),
        "w_k": per_head_w(w_in[D:2 * D]),
        "w_v": per_head_w(w_in[2 * D:]),
        "b_q": per_head_b(b_in[:D] * scale),
        "b_k": per_head_b(b_in[D:2 * D]),
        "b_v": per_head_b(b_in[2 * D:]),
        "w_o": p["out_proj_weight"].T.reshape(n_head, Dh, D).astype(COMPUTE_DTYPE),
        "b_o": p["out_proj_bias"].reshape(1, -1),
    }


def _prep_block(p, n_head, is_decoder):
    out = {
        "ff_w1": p["ff_w1"].T.astype(COMPUTE_DTYPE),
        "ff_b1": p["ff_b1"].reshape(1, -1),
        "ff_w2": p["ff_w2"].T.astype(COMPUTE_DTYPE),
        "ff_b2": p["ff_b2"].reshape(1, -1),
        "norm1_w": p["norm1_w"].reshape(1, -1), "norm1_b": p["norm1_b"].reshape(1, -1),
        "norm2_w": p["norm2_w"].reshape(1, -1), "norm2_b": p["norm2_b"].reshape(1, -1),
    }
    if is_decoder:
        out["masked_attn"] = _prep_mha(p["masked_attn"], n_head)
        out["cross_mul_attn"] = _prep_mha(p["cross_mul_attn"], n_head)
        out["norm3_w"] = p["norm3_w"].reshape(1, -1)
        out["norm3_b"] = p["norm3_b"].reshape(1, -1)
    else:
        out["mul_attn"] = _prep_mha(p["mul_attn"], n_head)
    return out


def prepare_params(params, n_head):
    return {
        "encoders": [_prep_block(p, n_head, False) for p in params["encoders"]],
        "decoders": [_prep_block(p, n_head, True) for p in params["decoders"]],
        "out_w": params["out_w"].T.astype(COMPUTE_DTYPE),
        "out_b": params["out_b"].reshape(1, -1),
    }


# ----------------------------- reference (mirrors kernel precision policy) ----
# Same math as the PyTorch module; matmul operands cast to bf16 with f32
# accumulation, mirroring the kernel precision policy so the check stays tight.

def _bf16_mm(x, w):
    return jnp.dot(x.astype(jnp.bfloat16), w.astype(jnp.bfloat16),
                   preferred_element_type=jnp.float32)


def _ref_ln(x, w, b):
    m = jnp.mean(x, -1, keepdims=True)
    v = jnp.mean((x - m) ** 2, -1, keepdims=True)
    return (x - m) * jax.lax.rsqrt(v + 1e-5) * w + b


def _ref_mha(x_q, x_kv, p, n_head, causal):
    B, Sq, D = x_q.shape
    Sk = x_kv.shape[1]
    Dh = D // n_head
    scale = 1.0 / math.sqrt(Dh)
    w_in, b_in = p["in_proj_weight"], p["in_proj_bias"]
    q = _bf16_mm(x_q.reshape(-1, D), (w_in[:D] * scale).T) + b_in[:D] * scale
    k = _bf16_mm(x_kv.reshape(-1, D), w_in[D:2 * D].T) + b_in[D:2 * D]
    v = _bf16_mm(x_kv.reshape(-1, D), w_in[2 * D:].T) + b_in[2 * D:]
    q = q.reshape(B, Sq, n_head, Dh).transpose(0, 2, 1, 3)
    k = k.reshape(B, Sk, n_head, Dh).transpose(0, 2, 1, 3)
    v = v.reshape(B, Sk, n_head, Dh).transpose(0, 2, 1, 3)
    s = jnp.einsum("bhqd,bhkd->bhqk", q.astype(jnp.bfloat16), k.astype(jnp.bfloat16),
                   preferred_element_type=jnp.float32)
    if causal:
        mask = jnp.tril(jnp.ones((Sq, Sk), bool))
        s = jnp.where(mask, s, MASK_VALUE)
    a = jax.nn.softmax(s, axis=-1)
    o = jnp.einsum("bhqk,bhkd->bhqd", a.astype(jnp.bfloat16), v.astype(jnp.bfloat16),
                   preferred_element_type=jnp.float32)
    o = o.transpose(0, 2, 1, 3).reshape(-1, D)
    o = _bf16_mm(o, p["out_proj_weight"].T) + p["out_proj_bias"]
    return o.reshape(B, Sq, D)


def _ref_ff(x, p):
    h = jnp.maximum(_bf16_mm(x, p["ff_w1"].T) + p["ff_b1"], 0.0)
    return _bf16_mm(h, p["ff_w2"].T) + p["ff_b2"]


def _ref_forward(params, x_encode, x_decode, n_head):
    enc = x_encode
    for p in params["encoders"]:
        a = _ref_mha(enc, enc, p["mul_attn"], n_head, False)
        enc = _ref_ln(enc + a, p["norm1_w"], p["norm1_b"])
        enc = _ref_ln(enc + _ref_ff(enc, p), p["norm2_w"], p["norm2_b"])
    dec = x_decode
    for p in params["decoders"]:
        a = _ref_mha(dec, dec, p["masked_attn"], n_head, True)
        dec = _ref_ln(dec + a, p["norm1_w"], p["norm1_b"])
        c = _ref_mha(dec, enc, p["cross_mul_attn"], n_head, False)
        dec = _ref_ln(dec + c, p["norm2_w"], p["norm2_b"])
        dec = _ref_ln(dec + _ref_ff(dec, p), p["norm3_w"], p["norm3_b"])
    B, Sd, D = dec.shape
    out = _bf16_mm(dec.reshape(-1, D), params["out_w"].T) + params["out_b"]
    return out.reshape(B, Sd, -1)


# ----------------------------- main -------------------------------------------

if __name__ == "__main__":
    d_model, n_head = 32, 4
    num_encoder, num_decoder = 2, 2
    vocab_size = 64
    B, S_enc, S_dec = 2, 8, 8

    key = jax.random.PRNGKey(0)
    k_p, k_e, k_d = jax.random.split(key, 3)
    params = init_transformer(k_p, d_model, num_encoder, num_decoder, vocab_size)
    kparams = prepare_params(params, n_head)

    x_encode = jax.random.normal(k_e, (B, S_enc, d_model), jnp.float32)
    x_decode = jax.random.normal(k_d, (B, S_dec, d_model), jnp.float32)

    out = transformer_forward(kparams, x_encode, x_decode, n_head)
    out = jax.block_until_ready(out)
    assert out.shape == (B, S_dec, vocab_size), out.shape

    ref = jax.block_until_ready(_ref_forward(params, x_encode, x_decode, n_head))
    max_err = float(jnp.max(jnp.abs(out - ref)))
    assert jnp.allclose(out, ref, atol=3e-2, rtol=3e-2), max_err

    print("KERNEL_OK")
</pallas_src>

<mosaic_0001>
module attributes {stable_mosaic.version = 11 : i64} {
  func.func @kernel(%arg0: i32, %arg1: i32, %arg2: i32, %arg3: memref<8x32xf32, #tpu.memory_space<vmem>>, %arg4: memref<1x32x8xbf16, #tpu.memory_space<vmem>>, %arg5: memref<1x32x8xbf16, #tpu.memory_space<vmem>>, %arg6: memref<1x32x8xbf16, #tpu.memory_space<vmem>>, %arg7: memref<1x1x8xf32, #tpu.memory_space<vmem>>, %arg8: memref<1x1x8xf32, #tpu.memory_space<vmem>>, %arg9: memref<1x1x8xf32, #tpu.memory_space<vmem>>, %arg10: memref<1x8x8xbf16, #tpu.memory_space<vmem>>, %arg11: memref<1x8x8xbf16, #tpu.memory_space<vmem>>, %arg12: memref<1x8x8xbf16, #tpu.memory_space<vmem>>) attributes {dimension_semantics = [#tpu.dimension_semantics<parallel>, #tpu.dimension_semantics<parallel>, #tpu.dimension_semantics<arbitrary>], iteration_bounds = array<i64: 2, 1, 4>, scalar_prefetch = 0 : i64, scratch_operands = 0 : i64, tpu.core_type = #tpu.core_type<tc>, window_params = [{transform_indices = @transform_0, window_bounds = array<i64: 8, 32>}, {transform_indices = @transform_1, window_bounds = array<i64: 1, 32, 8>}, {transform_indices = @transform_2, window_bounds = array<i64: 1, 32, 8>}, {transform_indices = @transform_3, window_bounds = array<i64: 1, 32, 8>}, {transform_indices = @transform_4, window_bounds = array<i64: 1, 1, 8>}, {transform_indices = @transform_5, window_bounds = array<i64: 1, 1, 8>}, {transform_indices = @transform_6, window_bounds = array<i64: 1, 1, 8>}, {transform_indices = @transform_7, window_bounds = array<i64: 1, 8, 8>}, {transform_indices = @transform_8, window_bounds = array<i64: 1, 8, 8>}, {transform_indices = @transform_9, window_bounds = array<i64: 1, 8, 8>}]} {
    %c0 = arith.constant 0 : index
    %c0_0 = arith.constant 0 : index
    %0 = vector.load %arg3[%c0, %c0_0] : memref<8x32xf32, #tpu.memory_space<vmem>>, vector<8x32xf32>
    %1 = arith.truncf %0 : vector<8x32xf32> to vector<8x32xbf16>
    %c0_1 = arith.constant 0 : index
    %c0_2 = arith.constant 0 : index
    %c0_3 = arith.constant 0 : index
    %2 = vector.load %arg4[%c0_1, %c0_2, %c0_3] : memref<1x32x8xbf16, #tpu.memory_space<vmem>>, vector<1x32x8xbf16>
    %3 = vector.shape_cast %2 : vector<1x32x8xbf16> to vector<32x8xbf16>
    %cst = arith.constant dense<0.000000e+00> : vector<8x8xf32>
    %4 = tpu.matmul %1, %3, %cst {dimension_numbers = #tpu.dot_dimension_numbers<[1], [0], [0], [1], [0, 0, 1, 1], [], []>} : vector<8x32xbf16>, vector<32x8xbf16>, vector<8x8xf32> -> vector<8x8xf32>
    %c0_4 = arith.constant 0 : index
    %c0_5 = arith.constant 0 : index
    %c0_6 = arith.constant 0 : index
    %5 = vector.load %arg7[%c0_4, %c0_5, %c0_6] : memref<1x1x8xf32, #tpu.memory_space<vmem>>, vector<1x1x8xf32>
    %6 = vector.shape_cast %5 : vector<1x1x8xf32> to vector<1x8xf32>
    %7 = vector.broadcast %6 : vector<1x8xf32> to vector<8x8xf32>
    %8 = arith.addf %4, %7 : vector<8x8xf32>
    %9 = vector.shape_cast %8 : vector<8x8xf32> to vector<1x8x8xf32>
    %10 = arith.truncf %9 : vector<1x8x8xf32> to vector<1x8x8xbf16>
    %c0_7 = arith.constant 0 : index
    %c0_8 = arith.constant 0 : index
    %c0_9 = arith.constant 0 : index
    %11 = vector.load %arg10[%c0_7, %c0_8, %c0_9] : memref<1x8x8xbf16, #tpu.memory_space<vmem>>, vector<1x8x8xbf16>
    tpu.vector_store %arg10[%c0_7, %c0_8, %c0_9], %10 {strides = array<i32>} : memref<1x8x8xbf16, #tpu.memory_space<vmem>>, vector<1x8x8xbf16>,
    %c0_10 = arith.constant 0 : index
    %c0_11 = arith.constant 0 : index
    %c0_12 = arith.constant 0 : index
    %12 = vector.load %arg5[%c0_10, %c0_11, %c0_12] : memref<1x32x8xbf16, #tpu.memory_space<vmem>>, vector<1x32x8xbf16>
    %13 = vector.shape_cast %12 : vector<1x32x8xbf16> to vector<32x8xbf16>
    %cst_13 = arith.constant dense<0.000000e+00> : vector<8x8xf32>
    %14 = tpu.matmul %1, %13, %cst_13 {dimension_numbers = #tpu.dot_dimension_numbers<[1], [0], [0], [1], [0, 0, 1, 1], [], []>} : vector<8x32xbf16>, vector<32x8xbf16>, vector<8x8xf32> -> vector<8x8xf32>
    %c0_14 = arith.constant 0 : index
    %c0_15 = arith.constant 0 : index
    %c0_16 = arith.constant 0 : index
    %15 = vector.load %arg8[%c0_14, %c0_15, %c0_16] : memref<1x1x8xf32, #tpu.memory_space<vmem>>, vector<1x1x8xf32>
    %16 = vector.shape_cast %15 : vector<1x1x8xf32> to vector<1x8xf32>
    %17 = vector.broadcast %16 : vector<1x8xf32> to vector<8x8xf32>
    %18 = arith.addf %14, %17 : vector<8x8xf32>
    %19 = vector.shape_cast %18 : vector<8x8xf32> to vector<1x8x8xf32>
    %20 = arith.truncf %19 : vector<1x8x8xf32> to vector<1x8x8xbf16>
    %c0_17 = arith.constant 0 : index
    %c0_18 = arith.constant 0 : index
    %c0_19 = arith.constant 0 : index
    %21 = vector.load %arg11[%c0_17, %c0_18, %c0_19] : memref<1x8x8xbf16, #tpu.memory_space<vmem>>, vector<1x8x8xbf16>
    tpu.vector_store %arg11[%c0_17, %c0_18, %c0_19], %20 {strides = array<i32>} : memref<1x8x8xbf16, #tpu.memory_space<vmem>>, vector<1x8x8xbf16>,
    %c0_20 = arith.constant 0 : index
    %c0_21 = arith.constant 0 : index
    %c0_22 = arith.constant 0 : index
    %22 = vector.load %arg6[%c0_20, %c0_21, %c0_22] : memref<1x32x8xbf16, #tpu.memory_space<vmem>>, vector<1x32x8xbf16>
    %23 = vector.shape_cast %22 : vector<1x32x8xbf16> to vector<32x8xbf16>
    %cst_23 = arith.constant dense<0.000000e+00> : vector<8x8xf32>
    %24 = tpu.matmul %1, %23, %cst_23 {dimension_numbers = #tpu.dot_dimension_numbers<[1], [0], [0], [1], [0, 0, 1, 1], [], []>} : vector<8x32xbf16>, vector<32x8xbf16>, vector<8x8xf32> -> vector<8x8xf32>
    %c0_24 = arith.constant 0 : index
    %c0_25 = arith.constant 0 : index
    %c0_26 = arith.constant 0 : index
    %25 = vector.load %arg9[%c0_24, %c0_25, %c0_26] : memref<1x1x8xf32, #tpu.memory_space<vmem>>, vector<1x1x8xf32>
    %26 = vector.shape_cast %25 : vector<1x1x8xf32> to vector<1x8xf32>
    %27 = vector.broadcast %26 : vector<1x8xf32> to vector<8x8xf32>
    %28 = arith.addf %24, %27 : vector<8x8xf32>
    %29 = vector.shape_cast %28 : vector<8x8xf32> to vector<1x8x8xf32>
    %30 = arith.truncf %29 : vector<1x8x8xf32> to vector<1x8x8xbf16>
    %c0_27 = arith.constant 0 : index
    %c0_28 = arith.constant 0 : index
    %c0_29 = arith.constant 0 : index
    %31 = vector.load %arg12[%c0_27, %c0_28, %c0_29] : memref<1x8x8xbf16, #tpu.memory_space<vmem>>, vector<1x8x8xbf16>
    tpu.vector_store %arg12[%c0_27, %c0_28, %c0_29], %30 {strides = array<i32>} : memref<1x8x8xbf16, #tpu.memory_space<vmem>>, vector<1x8x8xbf16>,
    return
  }
  func.func @transform_0(%arg0: i32, %arg1: i32, %arg2: i32) -> (i32, i32) {
    %c1_i32 = arith.constant 1 : i32
    %0 = arith.muli %arg0, %c1_i32 : i32
    %1 = arith.addi %0, %arg1 : i32
    %c0_i32 = arith.constant 0 : i32
    %c0_i32_0 = arith.constant 0 : i32
    return %1, %c0_i32 : i32, i32
  }
  func.func @transform_1(%arg0: i32, %arg1: i32, %arg2: i32) -> (i32, i32, i32) {
    %c0_i32 = arith.constant 0 : i32
    %c0_i32_0 = arith.constant 0 : i32
    %c0_i32_1 = arith.constant 0 : i32
    return %arg2, %c0_i32, %c0_i32_0 : i32, i32, i32
  }
  func.func @transform_2(%arg0: i32, %arg1: i32, %arg2: i32) -> (i32, i32, i32) {
    %c0_i32 = arith.constant 0 : i32
    %c0_i32_0 = arith.constant 0 : i32
    %c0_i32_1 = arith.constant 0 : i32
    return %arg2, %c0_i32, %c0_i32_0 : i32, i32, i32
  }
  func.func @transform_3(%arg0: i32, %arg1: i32, %arg2: i32) -> (i32, i32, i32) {
    %c0_i32 = arith.constant 0 : i32
    %c0_i32_0 = arith.constant 0 : i32
    %c0_i32_1 = arith.constant 0 : i32
    return %arg2, %c0_i32, %c0_i32_0 : i32, i32, i32
  }
  func.func @transform_4(%arg0: i32, %arg1: i32, %arg2: i32) -> (i32, i32, i32) {
    %c0_i32 = arith.constant 0 : i32
    %c0_i32_0 = arith.constant 0 : i32
    %c0_i32_1 = arith.constant 0 : i32
    return %arg2, %c0_i32, %c0_i32_0 : i32, i32, i32
  }
  func.func @transform_5(%arg0: i32, %arg1: i32, %arg2: i32) -> (i32, i32, i32) {
    %c0_i32 = arith.constant 0 : i32
    %c0_i32_0 = arith.constant 0 : i32
    %c0_i32_1 = arith.constant 0 : i32
    return %arg2, %c0_i32, %c0_i32_0 : i32, i32, i32
  }
  func.func @transform_6(%arg0: i32, %arg1: i32, %arg2: i32) -> (i32, i32, i32) {
    %c0_i32 = arith.constant 0 : i32
    %c0_i32_0 = arith.constant 0 : i32
    %c0_i32_1 = arith.constant 0 : i32
    return %arg2, %c0_i32, %c0_i32_0 : i32, i32, i32
  }
  func.func @transform_7(%arg0: i32, %arg1: i32, %arg2: i32) -> (i32, i32, i32) {
    %c4_i32 = arith.constant 4 : i32
    %0 = arith.muli %arg0, %c4_i32 : i32
    %1 = arith.addi %0, %arg2 : i32
    %c0_i32 = arith.constant 0 : i32
    %c0_i32_0 = arith.constant 0 : i32
    return %1, %arg1, %c0_i32 : i32, i32, i32
  }
  func.func @transform_8(%arg0: i32, %arg1: i32, %arg2: i32) -> (i32, i32, i32) {
    %c4_i32 = arith.constant 4 : i32
    %0 = arith.muli %arg0, %c4_i32 : i32
    %1 = arith.addi %0, %arg2 : i32
    %c0_i32 = arith.constant 0 : i32
    %c0_i32_0 = arith.constant 0 : i32
    return %1, %arg1, %c0_i32 : i32, i32, i32
  }
  func.func @transform_9(%arg0: i32, %arg1: i32, %arg2: i32) -> (i32, i32, i32) {
    %c4_i32 = arith.constant 4 : i32
    %0 = arith.muli %arg0, %c4_i32 : i32
    %1 = arith.addi %0, %arg2 : i32
    %c0_i32 = arith.constant 0 : i32
    %c0_i32_0 = arith.constant 0 : i32
    return %1, %arg1, %c0_i32 : i32, i32, i32
  }
}

</mosaic_0001>

<bundles_post_ra>
// kernel: tpu_custom_call.1
= control target key start
LH: loop header
LB: loop body
LE: loop exit
PB: predicated region body
PF: predicated region fallthrough
CT: control target
= control target key end

     0   :  { %s1476_s0 = inlined_call_operand.vmem [shape: f32[16,32], index: 0, kind: input, shape index: {}]   ;;  %s1477_s1 = inlined_call_operand.vmem [shape: bf16[4,32,8], index: 1, kind: input, shape index: {}]   ;;  %s1478_s2 = inlined_call_operand.vmem [shape: bf16[4,32,8], index: 2, kind: input, shape index: {}]   ;;  %s1479_s3 = inlined_call_operand.vmem [shape: bf16[4,32,8], index: 3, kind: input, shape index: {}]   ;;  %s1480_s4 = inlined_call_operand.vmem [shape: f32[4,1,8], index: 4, kind: input, shape index: {}]   ;;  %s1481_s5 = inlined_call_operand.vmem [shape: f32[4,1,8], index: 5, kind: input, shape index: {}]   ;;  %s1482_s6 = inlined_call_operand.vmem [shape: f32[4,1,8], index: 6, kind: input, shape index: {}]   ;;  %s1483_s7 = inlined_call_operand.hbm [shape: bf16[8,8,8], index: 7, kind: output, shape index: {0}]   ;;  %s1484_s8 = inlined_call_operand.hbm [shape: bf16[8,8,8], index: 8, kind: output, shape index: {1}]   ;;  %s1485_s9 = inlined_call_operand.hbm [shape: bf16[8,8,8], index: 9, kind: output, shape index: {2}]  }
   0x1   :  { %1500 = sst [smem:[#allocation19_spill]] %s1485_s9 }
   0x2   :  { %15 = vsyncpa [#allocation3], 0 }
   0x3   :  { %17 = vsyncpa [#allocation3 + $0x1], 0 }
   0x4   :  { %18 = vsyncpa [#allocation5], 0 }
   0x5   :  { %20 = vsyncpa [#allocation5 + $0x1], 0  ;;  %s1240_s30 = smov 0   ;;  %s1242_s10 = smov 0  }
   0x6   :  { %s1244_s11 = smov 0   ;;  %s1246_s12 = smov 0  }
   0x7   :  { %s1248_s13 = smov 0   ;;  %s1250_s14 = smov 0  }
   0x8   :  { %s1252_s15 = smov 0   ;;  %s1254_s16 = smov 0  }
   0x9 LB: > { %1501 = sst [smem:[#allocation9_spill]] %s1160_s30  ;;  %s1487_s17 = sadd.s32 4294967295, %s1188_s16   ;;  %s1188_s16 = sphi %s1254_s16, %s26_s16   ;;  %s1184_s15 = sphi %s1252_s15, %s1527_s15   ;;  %s1180_s14 = sphi %s1250_s14, %s1526_s14   ;;  %s1176_s13 = sphi %s1248_s13, %s1525_s13   ;;  %s1172_s12 = sphi %s1246_s12, %s1524_s12   ;;  %s1168_s11 = sphi %s1244_s11, %s1523_s11   ;;  %s1164_s10 = sphi %s1242_s10, %s1529_s10   ;;  %s1160_s30 = sphi %s1240_s30, %s1528_s30  }
   0xa   : > { %1502 = sst [smem:[#allocation10_spill]] %s1168_s11  ;;  %s38_s18 = sadd.s32 1, %s1180_s14 }
   0xb   : > { %1503 = sst [smem:[#allocation11_spill]] %s1180_s14  ;;  %s45_s19 = sadd.s32 1, %s1184_s15 }
   0xc   : > { %1504 = sst [smem:[#allocation12_spill]] %s1184_s15  ;;  %p39_p0 = scmp.ge.s32.totalorder %s38_s18, 4 }
   0xd   : > { %s884_s20 = sshll.u32 %s1184_s15, 2  ;;  %s1486_s21 = sadd.s32 4294967294, %s1188_s16  }
   0xe   : > { %s234_s22 = sadd.s32 %s1180_s14, %s884_s20  ;;  %s1531_s18 = smov (%p39_p0, %s38_s18), 0 }
   0xf   : > { %1505 = sst [smem:[#allocation13_spill]] %s1531_s18  ;;  %s1533_s19 = smov (!%p39_p0, %s45_s19), %s1184_s15 }
  0x10   : > { %p252_p1 = scmp.ne.s32.totalorder %s1168_s11, %s1164_s10  ;;  %p253_p2 = scmp.eq.s32.totalorder %s1487_s17, 7 }
  0x11   : > { %p47_p3 = scmp.ge.s32.totalorder %s1533_s19, 2  ;;  %p258_p4 = scmp.ne.s32.totalorder %s1164_s10, %s1160_s30 }
  0x12   : > { %p1295_p5 = por %p253_p2, %p252_p1  ;;  %p259_p6 = scmp.eq.s32.totalorder %s1486_s21, 7 }
  0x13   : > { %s1535_s19 = smov (%p47_p3, %s1533_s19), 0  ;;  %p892_p8 = scmp.ge.s32.totalorder %s1188_s16, 1 }
  0x14   : > { %s1506_s23 = scalar_select %p1295_p5, 1, 0 }
  0x15   : > { %1508 = sst [smem:[#allocation15_spill]] %s1535_s19  ;;  %p1303_p7 = por %p259_p6, %p258_p4 }
  0x16   : > { %1507 = sst [smem:[#allocation14_spill]] %s1506_s23  ;;  %s885_s25 = sshll.u32 %s1535_s19, 2 }
  0x17   : > { %s1509_s24 = scalar_select %p1303_p7, 1, 0 }
  0x18   : > { %p392_p9 = scmp.lt.s32.totalorder %s1188_s16, 9  ;;  %s236_s26 = sadd.s32 %s885_s25, %s1531_s18 }
  0x19   : > { %1510 = sst [smem:[#allocation16_spill]] %s1509_s24  ;;  %s242_s27 = sadd.s32 1, %s1168_s11 }
  0x1a   : > { %s237_s28 = ssub.s32 %s234_s22, %s236_s26  ;;  %p393_p10 = pnand %p892_p8, %p392_p9 }
  0x1b   : > { %p240_p11 = scmp.eq.s32.totalorder %s237_s28, 0 }
  0x1c   : > { %396 = sbr.rel (%p393_p10) target bundleno = 209 (0xd1), region = 48 }
  0x1d   : > { %s1313_s29 = scalar_select %p240_p11, %s1168_s11, %s242_s27  }
  0x1f   : > { %1511 = sst [smem:[#allocation17_spill]] %s1313_s29 }
  0x21   : > { %p468_p12 = scmp.lt.s32.totalorder %s1172_s12, 3  ;;  %p463_p13 = scmp.lt.s32.totalorder %s1176_s13, 1  ;;  %vm521_vm0 = vcmask 261120   ;;  %vm539_vm1 = vcmask 60416  }
  0x22   : > { %s933_s18 = sshll.u32 %s1176_s13, 2  ;;  %s1512_s27 = sadd.s32 4294967295, %s1188_s16  }
  0x23   : > { %s1318_s20 = scalar_select %p468_p12, %s1172_s12, 3 }
  0x24   : > { %s464_s21 = scalar_select %p463_p13, %s1176_s13, 1 }
  0x25   : > { %s941_s17 = sshll.u32 %s1318_s20, 4  ;;  %s485_s22 = scalar_lea.vmem %s1480_s4, %s1318_s20 }
  0x26   : > { %s472_s28 = scalar_lea.vmem %s1477_s1, %s941_s17  ;;  %s477_s14 = scalar_lea.vmem %s1478_s2, %s941_s17  ;;  %v1031_v8 = vld [vmem:[%s485_s22] ss:$0 sm:$0xff] }
  0x27   : > { %v945_v0 = vld [vmem:[%s472_s28 + $0x8] sm:$0xff]  ;;  %s482_s24 = scalar_lea.vmem %s1479_s3, %s941_s17  ;;  %s896_s30 = sshll.u32 %s464_s21, 3  ;;  %v944_v3 = vld [vmem:[%s472_s28] sm:$0xff] }
  0x28   : > { %v947_v1 = vld [vmem:[%s477_s14 + $0x8] sm:$0xff]  ;;  %s466_s19 = scalar_lea.vmem %s1476_s0, %s896_s30  ;;  %531 = vmatpush.bf16.msra.mxu0 %v945_v0  ;;  %v946_v4 = vld [vmem:[%s477_s14] sm:$0xff]  ;;  %s488_s11 = scalar_lea.vmem %s1481_s5, %s1318_s20 }
  0x29   : > { %v949_v2 = vld [vmem:[%s482_s24 + $0x8] sm:$0xff]  ;;  %567 = vmatpush.bf16.msra.mxu1 %v947_v1  ;;  %v499_v5 = vld [vmem:[%s466_s19] sm:$0xff]  ;;  %s491_s17 = scalar_lea.vmem %s1482_s6, %s1318_s20  ;;  %s1498_s21 = sand.u32 1, %s1164_s10  }
  0x2a   : > { %602 = vmatpush.bf16.msra.mxu2 %v949_v2  ;;  %v948_v6 = vld [vmem:[%s482_s24] sm:$0xff]  ;;  %v500_v7 = vpack.c.bf16 %v499_v5, %v499_v5  ;;  %s630_s23 = sadd.s32 %s1172_s12, %s933_s18  ;;  %s1351_s24 = sshll.u32 %s1498_s21, 2 }
  0x2b   : > { %s934_s29 = sshll.u32 %s630_s23, 2  ;;  %v1032_v9 = vld [vmem:[%s488_s11] ss:$0 sm:$0xff]  ;;  %s1360_s28 = sand.u32 1, %s1512_s27  }
  0x2c   : > { %532 = vmatpush.bf16.msra.mxu0 %v944_v3  ;;  %s652_s12 = scalar_lea.hbm %s1484_s8, %s934_s29  ;;  %s635_s14 = scalar_lea.hbm %s1483_s7, %s934_s29  ;;  %v1033_v16 = vld [vmem:[%s491_s17] ss:$0 sm:$0xff] }
  0x2d   : > { %568 = vmatpush.bf16.msra.mxu1 %v946_v4  ;;  %s454_s15 = scalar_lea.vmem [#allocation4], %s1351_s24  ;;  %s1371_s20 = sshll.u32 %s652_s12, 4  ;;  %s657_s20 = int_to_ptr.hbm [resolvable:$true] %s1371_s20 }
  0x2e   : > { %603 = vmatpush.bf16.msra.mxu2 %v948_v6  ;;  %s1369_s18 = sshll.u32 %s454_s15, 4  ;;  %s447_s22 = scalar_lea.vmem [#allocation2], %s1351_s24  ;;  %s655_s18 = int_to_ptr.vmem [resolvable:$true] %s1369_s18 }
  0x2f   : > { %911 = vmatmul.msk.bf16.vlgmr.msra.gmra.mxu0 %vm521_vm0, %v500_v7  ;;  %s1376_s11 = sshll.u32 %s447_s22, 4  ;;  %s1378_s23 = sshll.u32 %s635_s14, 4  ;;  %s640_s23 = int_to_ptr.hbm [resolvable:$true] %s1378_s23 }
  0x30   : > { %920 = vmatmul.msk.bf16.vlgmr.msra.gmra.mxu1 %vm521_vm0, %v500_v7  ;;  %1513 = sst [smem:[#allocation18_spill]] %s1376_s11  ;;  %s461_s12 = scalar_lea.vmem [#allocation6], %s1351_s24 }
  0x31   : > { %929 = vmatmul.msk.bf16.vlgmr.msra.gmra.mxu2 %vm521_vm0, %v500_v7  ;;  %s1514_s27 = sld [smem:[#allocation19_spill]]  ;;  %s1391_s9 = sshll.u32 %s461_s12, 4  ;;  %s672_s9 = int_to_ptr.vmem [resolvable:$true] %s1391_s9 }
  0x32   : > { %s617_s14 = scalar_lea.sflag [#allocation5], %s1360_s28  ;;  %s1048_s21 = sshra.s32 %s657_s20, 4  ;;  %s1049_s21 = int_to_ptr.hbm [resolvable:$true] %s1048_s21 }
  0x33   : > { %s1050_s25 = scalar_lea.hbm %s1049_s21, 4  ;;  %s1054_s26 = scalar_lea.hbm %s1484_s8, 32 }
  0x34   : > { %p1051_p0 = scmp.ne.s32.totalorder %s1049_s21, %s1050_s25  ;;  %p1055_p3 = scmp.lt.s32.totalorder %s1049_s21, %s1484_s8 }
  0x35   : > { %p1056_p4 = scmp.lt.s32.totalorder %s1054_s26, %s1050_s25 }
  0x36   : > { %p1052_p1 = pnand %p1051_p0, %p1295_p5 }
  0x37   : > { %s669_s19 = scalar_lea.hbm %s1514_s27, %s934_s29  ;;  %p1057_p6 = por %p1056_p4, %p1055_p3 }
  0x38   : > { %s1393_s30 = sshll.u32 %s669_s19, 4  ;;  %p1053_p2 = pneg %p1052_p1  ;;  %s674_s30 = int_to_ptr.hbm [resolvable:$true] %s1393_s30 }
  0x3a   : > { %p1058_p8 = pnand %p1057_p6, %p1053_p2 }
  0xac   : > { %v534_v10 = vpop.f32.mrf.mxu0 }
  0xad   : > { %v570_v11 = vpop.f32.mrf.mxu1  ;;  %v535_v12 = vadd.f32 %v1031_v8, %v534_v10 }
  0xae   : > { %v571_v13 = vadd.f32 %v1032_v9, %v570_v11 }
  0xaf   : > { %v538_v14 = vpack.c.bf16 %v535_v12, %v535_v12 }
  0xb0   : > { %v574_v15 = vpack.c.bf16 %v571_v13, %v571_v13 }
  0xb2   : > { %575 = vst.msk [vmem:[%s454_s15] sm:$0xf] %vm539_vm1, %v574_v15 }
  0xb3   : > { %1061 = shalt.err (!%p1058_p8)
}
  0xb4   : > { %951 = dma.vmem_to_hbm [thread:$0]  (%p1295_p5), %s655_s18, 64, %s657_s20, %s617_s14   ;;  %540 = vst.msk [vmem:[%s447_s22] sm:$0xf] %vm539_vm1, %v538_v14  ;;  %v605_v17 = vpop.f32.mrf.mxu2 }
  0xb5   : > { %s1516_s19 = sand.u32 1, %s1164_s10   ;;  %s1076_s21 = sshra.s32 %s640_s23, 4  ;;  %s1077_s21 = int_to_ptr.hbm [resolvable:$true] %s1076_s21 }
  0xb6   : > { %s612_s11 = scalar_lea.sflag [#allocation3], %s1516_s19  ;;  %s1078_s25 = scalar_lea.hbm %s1077_s21, 4 }
  0xb7   : > { %p1079_p9 = scmp.ne.s32.totalorder %s1077_s21, %s1078_s25  ;;  %s1082_s26 = scalar_lea.hbm %s1483_s7, 32 }
  0xb8   : > { %p1083_p12 = scmp.lt.s32.totalorder %s1077_s21, %s1483_s7  ;;  %p1084_p13 = scmp.lt.s32.totalorder %s1082_s26, %s1078_s25 }
  0xb9   : > { %p1080_p10 = pnand %p1079_p9, %p1295_p5 }
  0xba   : > { %p1085_p0 = por %p1084_p13, %p1083_p12 }
  0xbb   : > { %p1081_p11 = pneg %p1080_p10 }
  0xbd   : > { %p1086_p1 = pnand %p1085_p0, %p1081_p11 }
  0xbf   : > { %1089 = shalt.err (!%p1086_p1)
}
  0xc0   : > { %s1517_s20 = sld [smem:[#allocation18_spill]]  ;;  %v606_v18 = vadd.f32 %v1033_v16, %v605_v17  ;;  %v536_v19 = vpop.f32.mrf.mxu0  ;;  %v572_v20 = vpop.f32.mrf.mxu1  ;;  %s1104_s19 = sshra.s32 %s674_s30, 4  ;;  %s1105_s19 = int_to_ptr.hbm [resolvable:$true] %s1104_s19 }
  0xc1   : > { %s1106_s21 = scalar_lea.hbm %s1105_s19, 4  ;;  %p1111_p6 = scmp.lt.s32.totalorder %s1105_s19, %s1514_s27 }
  0xc2   : > { %v609_v21 = vpack.c.bf16 %v606_v18, %v606_v18  ;;  %p1107_p2 = scmp.ne.s32.totalorder %s1105_s19, %s1106_s21 }
  0xc4   : > { %610 = vst.msk [vmem:[%s461_s12] sm:$0xf] %vm539_vm1, %v609_v21  ;;  %p1108_p3 = pnand %p1107_p2, %p1295_p5 }
  0xc6   : > { %s1518_s22 = int_to_ptr.vmem [resolvable:$true] %s1517_s20  ;;  %p1109_p4 = pneg %p1108_p3 }
  0xc7   : > { %950 = dma.vmem_to_hbm [thread:$0]  (%p1295_p5), %s1518_s22, 64, %s640_s23, %s612_s11  }
  0xc8   : > { %s1110_s23 = scalar_lea.hbm %s1514_s27, 32 }
  0xc9   : > { %p1112_p8 = scmp.lt.s32.totalorder %s1110_s23, %s1106_s21 }
  0xcb   : > { %p1113_p9 = por %p1112_p8, %p1111_p6 }
  0xcd   : > { %p1114_p10 = pnand %p1113_p9, %p1109_p4 }
  0xcf   : > { %1117 = shalt.err (!%p1114_p10)
}
  0xd0   : > { %952 = dma.vmem_to_hbm [thread:$0]  (%p1295_p5), %s672_s9, 64, %s674_s30, %s617_s14   ;;  %v607_v22 = vpop.f32.mrf.mxu2 }
  0xd1 PF: > { %s1519_s24 = sld [smem:[#allocation9_spill]]  ;;  %p966_p11 = scmp.ge.s32.totalorder %s1188_s16, 2 }
  0xd3   : > { %p957_p12 = pnand %p966_p11, %p1303_p7 }
  0xd5   : > { %p958_p13 = pneg %p957_p12 }
  0xd7   : > { %s685_s26 = sand.u32 1, %s1519_s24  }
  0xd8   : > { %s686_s15 = scalar_lea.sflag [#allocation3], %s685_s26 }
  0xd9   : > { %1151 = dma.done.wait (%p958_p13), %s686_s15, 64  }
  0xda   : > { %1153 = vsyncadd (%p958_p13), %s686_s15, 4294967232  ;;  %s1521_s18 = sadd.s32 4294967294, %s1188_s16  }
  0xdb   : > { %s695_s20 = sand.u32 1, %s1521_s18  }
  0xdc   : > { %s696_s13 = scalar_lea.sflag [#allocation5], %s695_s20 }
  0xdd   : > { %1155 = dma.done.wait (%p958_p13), %s696_s13, 128  }
  0xde   : > { %1157 = vsyncadd (%p958_p13), %s696_s13, 4294967168  ;;  %s26_s16 = sadd.s32 1, %s1188_s16   ;;  %s1522_s28 = sld [smem:[#allocation10_spill]] }
  0xdf   : > { %p23_p5 = scmp.ge.s32.totalorder %s26_s16, 10   ;;  %s1523_s11 = sld [smem:[#allocation17_spill]] }
  0xe0   : > { %s1524_s12 = sld [smem:[#allocation11_spill]]  ;;  %s1528_s30 = smov %s1164_s10 }
  0xe1   : > { %s1525_s13 = sld [smem:[#allocation12_spill]]  ;;  %25 = sbr.rel (!%p23_p5) target bundleno = 9 (0x9), region = 133 }
  0xe2   : > { %s1526_s14 = sld [smem:[#allocation13_spill]] }
  0xe3   : > { %s1527_s15 = sld [smem:[#allocation15_spill]] }
  0xe4   : > { %s1529_s10 = smov %s1522_s28 }
  0xe6   :  { %712 = vsyncpa [#allocation3], 1 }
  0xe7   :  { %714 = vsyncpa [#allocation3 + $0x1], 1 }
  0xe8   :  { %715 = vsyncpa [#allocation5], 1 }
  0xe9   :  { %717 = vsyncpa [#allocation5 + $0x1], 1 }

</bundles_post_ra>
